<compile_context>
chip_gen: v7x
topology: tpu7x:2x2x1
jax: 0.10.0
libtpu: 0.0.40
codegen_flags: <defaults>
</compile_context>

<pallas_src>
import jax
import jax.numpy as jnp
from jax.experimental import pallas as pl
from jax.experimental.pallas import tpu as pltpu

IN_DIM = 100
HID_DIM = 200
OUT_DIM = 784

# Lane-aligned padded feature sizes for the inner dims.
IN_PAD = 128
HID_PAD = 256

LN_EPS = 1e-5
LEAKY_SLOPE = 0.02


def generator_kernel(x_ref, w1_ref, b1_ref, g_ref, beta_ref, w2_ref, b2_ref, o_ref):
    # ---- Linear(100 -> 200), bf16 operands, f32 accumulation ----
    x = x_ref[...].astype(jnp.bfloat16)                               # (TB, 128)
    h = jnp.dot(x, w1_ref[...], preferred_element_type=jnp.float32)   # (TB, 256) f32
    h = h + b1_ref[...]

    # ---- LeakyReLU(negative_slope=0.02) ----
    h = jnp.where(h > 0, h, LEAKY_SLOPE * h)

    # ---- LayerNorm(200), eps=1e-5, biased variance (f32, single pass) ----
    # Padded lanes (200..255) of h are exactly zero, so summing over all 256 lanes
    # equals summing over the real 200; divide by the true feature count.
    s1 = jnp.sum(h, axis=-1, keepdims=True)
    s2 = jnp.sum(h * h, axis=-1, keepdims=True)
    inv_n = jnp.float32(1.0 / HID_DIM)
    mean = s1 * inv_n
    var = s2 * inv_n - mean * mean
    h = (h - mean) * jax.lax.rsqrt(var + LN_EPS)
    # gamma/beta are zero on the padded lanes -> padded lanes of h return to zero.
    h = h * g_ref[...] + beta_ref[...]

    # ---- Linear(200 -> 784), bf16 operands, f32 accumulation ----
    y = jnp.dot(h.astype(jnp.bfloat16), w2_ref[...],
                preferred_element_type=jnp.float32)                   # (TB, 784) f32
    y = y + b2_ref[...]

    # ---- Sigmoid via a single EUP tanh; cast to output dtype on store ----
    o_ref[...] = (0.5 * (1.0 + jnp.tanh(0.5 * y))).astype(o_ref.dtype)


def _round_up(n, m):
    return ((n + m - 1) // m) * m


def _pad_axis(a, axis, target):
    pad = target - a.shape[axis]
    if pad == 0:
        return a
    widths = [(0, 0)] * a.ndim
    widths[axis] = (0, pad)
    return jnp.pad(a, widths)


def prepare_params(params):
    """One-time parameter prep: zero-pad to lane-aligned shapes, cast weights to bf16.

    Input shapes (PyTorch-Linear weights already transposed to (in, out)):
      w1 (100,200)  b1 (1,200)  gamma (1,200)  beta (1,200)  w2 (200,784)  b2 (1,784)
    """
    w1, b1, g, beta, w2, b2 = params
    w1p = _pad_axis(_pad_axis(w1, 0, IN_PAD), 1, HID_PAD).astype(jnp.bfloat16)   # (128,256)
    b1p = _pad_axis(b1.reshape(1, -1), 1, HID_PAD).astype(jnp.float32)           # (1,256)
    gp = _pad_axis(g.reshape(1, -1), 1, HID_PAD).astype(jnp.float32)             # (1,256)
    betap = _pad_axis(beta.reshape(1, -1), 1, HID_PAD).astype(jnp.float32)       # (1,256)
    w2p = _pad_axis(w2, 0, HID_PAD).astype(jnp.bfloat16)                         # (256,784)
    b2p = b2.reshape(1, -1).astype(jnp.float32)                                  # (1,784)
    return (w1p, b1p, gp, betap, w2p, b2p)


def generator_forward(x, prepared_params, *, batch_tile=512, out_dtype=jnp.bfloat16):
    """x: (B, 100) float32.  Returns (B, 784) in `out_dtype` (default bfloat16)."""
    w1p, b1p, gp, betap, w2p, b2p = prepared_params
    B = x.shape[0]

    # Lane-align the input features (zero padding keeps the math identical).
    xp = _pad_axis(x.astype(jnp.float32), 1, IN_PAD)

    # Batch tiling:
    #   * pad batch only to a sublane multiple first,
    #   * cap the tile (default 512 so the parallel axis feeds both v7x TCs;
    #     v5e/v6e can sweep batch_tile up to 2048 within their 128 MiB VMEM),
    #   * keep >= 2 grid steps when the batch is big enough,
    #   * shrink the tile until padding waste stays <~12.5% of the real batch.
    Bp8 = _round_up(B, 8)
    tile = max(8, min(_round_up(batch_tile, 8), Bp8))
    if Bp8 >= 256:  # enough rows for two decent tiles -> guarantee grid >= 2
        tile = min(tile, _round_up((Bp8 + 1) // 2, 8))
    while tile > 64 and (_round_up(Bp8, tile) - Bp8) * 8 > Bp8:
        tile = _round_up(tile // 2, 8)
    Bp = _round_up(Bp8, tile)
    if Bp != B:
        xp = _pad_axis(xp, 0, Bp)

    grid = (Bp // tile,)
    const = lambda i: (0, 0)  # parameters fully resident across all grid steps
    # TODO(synk): on v7x, pipeline_mode=pl.Buffered(1) on the constant parameter
    # specs would avoid double-buffering ~1 MiB of weights (minor VMEM headroom).

    out = pl.pallas_call(
        generator_kernel,
        out_shape=jax.ShapeDtypeStruct((Bp, OUT_DIM), out_dtype),
        grid_spec=pltpu.PrefetchScalarGridSpec(
            num_scalar_prefetch=0,
            grid=grid,
            in_specs=[
                pl.BlockSpec((tile, IN_PAD), lambda i: (i, 0)),   # x (f32)
                pl.BlockSpec((IN_PAD, HID_PAD), const),           # w1 (bf16, in x out)
                pl.BlockSpec((1, HID_PAD), const),                # b1 (f32)
                pl.BlockSpec((1, HID_PAD), const),                # ln gamma (f32)
                pl.BlockSpec((1, HID_PAD), const),                # ln beta (f32)
                pl.BlockSpec((HID_PAD, OUT_DIM), const),          # w2 (bf16, in x out)
                pl.BlockSpec((1, OUT_DIM), const),                # b2 (f32)
            ],
            out_specs=pl.BlockSpec((tile, OUT_DIM), lambda i: (i, 0)),
        ),
        compiler_params=pltpu.CompilerParams(
            dimension_semantics=("parallel",),
            vmem_limit_bytes=32 * 1024 * 1024,
        ),
    )(xp, w1p, b1p, gp, betap, w2p, b2p)

    # Only strip batch padding (output feature dim is already exactly 784).
    return out if Bp == B else out[:B]


def init_params(key):
    """Deterministic synthetic parameters matching the nn.Module shapes."""
    k1, k2, k3, k4 = jax.random.split(key, 4)
    # PyTorch Linear default init ~ U(-1/sqrt(fan_in), 1/sqrt(fan_in)); emulate scale.
    w1 = jax.random.uniform(k1, (IN_DIM, HID_DIM), jnp.float32,
                            minval=-1.0, maxval=1.0) / jnp.sqrt(IN_DIM)
    b1 = jax.random.uniform(k2, (1, HID_DIM), jnp.float32,
                            minval=-1.0, maxval=1.0) / jnp.sqrt(IN_DIM)
    gamma = jnp.ones((1, HID_DIM), jnp.float32)   # LayerNorm weight init = 1
    beta = jnp.zeros((1, HID_DIM), jnp.float32)   # LayerNorm bias   init = 0
    w2 = jax.random.uniform(k3, (HID_DIM, OUT_DIM), jnp.float32,
                            minval=-1.0, maxval=1.0) / jnp.sqrt(HID_DIM)
    b2 = jax.random.uniform(k4, (1, OUT_DIM), jnp.float32,
                            minval=-1.0, maxval=1.0) / jnp.sqrt(HID_DIM)
    return (w1, b1, gamma, beta, w2, b2)


def reference_forward(x, params):
    """Pure-JAX f32 reference of the same forward pass, for validation."""
    w1, b1, g, beta, w2, b2 = params
    h = x @ w1 + b1
    h = jnp.where(h > 0, h, LEAKY_SLOPE * h)
    mean = jnp.mean(h, axis=-1, keepdims=True)
    var = jnp.mean((h - mean) ** 2, axis=-1, keepdims=True)
    h = (h - mean) / jnp.sqrt(var + LN_EPS) * g + beta
    y = h @ w2 + b2
    return jax.nn.sigmoid(y)


if __name__ == "__main__":
    key = jax.random.PRNGKey(0)
    kp, kx = jax.random.split(key)

    params = init_params(kp)
    prepared = prepare_params(params)   # one-time padded / bf16 weight prep

    B = 16  # small test batch; wrapper handles tiling/padding for any B
    x = jax.random.normal(kx, (B, IN_DIM), jnp.float32)  # random seed vectors

    out = generator_forward(x, prepared)
    out = jax.block_until_ready(out)

    ref = reference_forward(x, params)
    assert out.shape == (B, OUT_DIM)
    # bf16 matmul operands + bf16 output: relax tolerance vs the f32 reference.
    err = float(jnp.max(jnp.abs(out.astype(jnp.float32) - ref)))
    assert err < 3e-2, err

    print("KERNEL_OK")
</pallas_src>

<mosaic_0001>
module attributes {stable_mosaic.version = 11 : i64} {
  func.func @generator_kernel(%arg0: i32, %arg1: memref<16x128xf32, #tpu.memory_space<vmem>>, %arg2: memref<128x256xbf16, #tpu.memory_space<vmem>>, %arg3: memref<1x256xf32, #tpu.memory_space<vmem>>, %arg4: memref<1x256xf32, #tpu.memory_space<vmem>>, %arg5: memref<1x256xf32, #tpu.memory_space<vmem>>, %arg6: memref<256x784xbf16, #tpu.memory_space<vmem>>, %arg7: memref<1x784xf32, #tpu.memory_space<vmem>>, %arg8: memref<16x784xbf16, #tpu.memory_space<vmem>>) attributes {dimension_semantics = [#tpu.dimension_semantics<parallel>], iteration_bounds = array<i64: 1>, scalar_prefetch = 0 : i64, scratch_operands = 0 : i64, tpu.core_type = #tpu.core_type<tc>, window_params = [{transform_indices = @transform_0, window_bounds = array<i64: 16, 128>}, {pipeline_mode = #tpu.pipeline_mode<synchronous>, transform_indices = @transform_1, window_bounds = array<i64: 128, 256>}, {pipeline_mode = #tpu.pipeline_mode<synchronous>, transform_indices = @transform_2, window_bounds = array<i64: 1, 256>}, {pipeline_mode = #tpu.pipeline_mode<synchronous>, transform_indices = @transform_3, window_bounds = array<i64: 1, 256>}, {pipeline_mode = #tpu.pipeline_mode<synchronous>, transform_indices = @transform_4, window_bounds = array<i64: 1, 256>}, {pipeline_mode = #tpu.pipeline_mode<synchronous>, transform_indices = @transform_5, window_bounds = array<i64: 256, 784>}, {pipeline_mode = #tpu.pipeline_mode<synchronous>, transform_indices = @transform_6, window_bounds = array<i64: 1, 784>}, {transform_indices = @transform_7, window_bounds = array<i64: 16, 784>}]} {
    %c0 = arith.constant 0 : index
    %c0_0 = arith.constant 0 : index
    %0 = vector.load %arg1[%c0, %c0_0] : memref<16x128xf32, #tpu.memory_space<vmem>>, vector<16x128xf32>
    %1 = arith.truncf %0 : vector<16x128xf32> to vector<16x128xbf16>
    %c0_1 = arith.constant 0 : index
    %c0_2 = arith.constant 0 : index
    %2 = vector.load %arg2[%c0_1, %c0_2] : memref<128x256xbf16, #tpu.memory_space<vmem>>, vector<128x256xbf16>
    %cst = arith.constant dense<0.000000e+00> : vector<16x256xf32>
    %3 = tpu.matmul %1, %2, %cst {dimension_numbers = #tpu.dot_dimension_numbers<[1], [0], [0], [1], [0, 0, 1, 1], [], []>} : vector<16x128xbf16>, vector<128x256xbf16>, vector<16x256xf32> -> vector<16x256xf32>
    %c0_3 = arith.constant 0 : index
    %c0_4 = arith.constant 0 : index
    %4 = vector.load %arg3[%c0_3, %c0_4] : memref<1x256xf32, #tpu.memory_space<vmem>>, vector<1x256xf32>
    %5 = vector.broadcast %4 : vector<1x256xf32> to vector<16x256xf32>
    %6 = arith.addf %3, %5 : vector<16x256xf32>
    %cst_5 = arith.constant 0.000000e+00 : f32
    %7 = vector.broadcast %cst_5 : f32 to vector<16x256xf32>
    %8 = arith.cmpf ogt, %6, %7 : vector<16x256xf32>
    %cst_6 = arith.constant 2.000000e-02 : f32
    %9 = vector.broadcast %cst_6 : f32 to vector<16x256xf32>
    %10 = arith.mulf %9, %6 : vector<16x256xf32>
    %11 = arith.select %8, %6, %10 : vector<16x256xi1>, vector<16x256xf32>
    %cst_7 = arith.constant dense<0.000000e+00> : vector<16xf32>
    %12 = vector.multi_reduction <add>, %11, %cst_7 [1] : vector<16x256xf32> to vector<16xf32>
    %13 = vector.shape_cast %12 : vector<16xf32> to vector<16x1xf32>
    %14 = arith.mulf %11, %11 : vector<16x256xf32>
    %cst_8 = arith.constant dense<0.000000e+00> : vector<16xf32>
    %15 = vector.multi_reduction <add>, %14, %cst_8 [1] : vector<16x256xf32> to vector<16xf32>
    %16 = vector.shape_cast %15 : vector<16xf32> to vector<16x1xf32>
    %cst_9 = arith.constant 5.000000e-03 : f32
    %17 = vector.broadcast %cst_9 : f32 to vector<16x1xf32>
    %18 = arith.mulf %13, %17 : vector<16x1xf32>
    %cst_10 = arith.constant 5.000000e-03 : f32
    %19 = vector.broadcast %cst_10 : f32 to vector<16x1xf32>
    %20 = arith.mulf %16, %19 : vector<16x1xf32>
    %21 = arith.mulf %18, %18 : vector<16x1xf32>
    %22 = arith.subf %20, %21 : vector<16x1xf32>
    %23 = vector.broadcast %18 : vector<16x1xf32> to vector<16x256xf32>
    %24 = arith.subf %11, %23 : vector<16x256xf32>
    %cst_11 = arith.constant 9.99999974E-6 : f32
    %25 = vector.broadcast %cst_11 : f32 to vector<16x1xf32>
    %26 = arith.addf %22, %25 : vector<16x1xf32>
    %27 = math.rsqrt %26 : vector<16x1xf32>
    %28 = vector.broadcast %27 : vector<16x1xf32> to vector<16x256xf32>
    %29 = arith.mulf %24, %28 : vector<16x256xf32>
    %c0_12 = arith.constant 0 : index
    %c0_13 = arith.constant 0 : index
    %30 = vector.load %arg4[%c0_12, %c0_13] : memref<1x256xf32, #tpu.memory_space<vmem>>, vector<1x256xf32>
    %31 = vector.broadcast %30 : vector<1x256xf32> to vector<16x256xf32>
    %32 = arith.mulf %29, %31 : vector<16x256xf32>
    %c0_14 = arith.constant 0 : index
    %c0_15 = arith.constant 0 : index
    %33 = vector.load %arg5[%c0_14, %c0_15] : memref<1x256xf32, #tpu.memory_space<vmem>>, vector<1x256xf32>
    %34 = vector.broadcast %33 : vector<1x256xf32> to vector<16x256xf32>
    %35 = arith.addf %32, %34 : vector<16x256xf32>
    %36 = arith.truncf %35 : vector<16x256xf32> to vector<16x256xbf16>
    %c0_16 = arith.constant 0 : index
    %c0_17 = arith.constant 0 : index
    %37 = vector.load %arg6[%c0_16, %c0_17] : memref<256x784xbf16, #tpu.memory_space<vmem>>, vector<256x784xbf16>
    %cst_18 = arith.constant dense<0.000000e+00> : vector<16x784xf32>
    %38 = tpu.matmul %36, %37, %cst_18 {dimension_numbers = #tpu.dot_dimension_numbers<[1], [0], [0], [1], [0, 0, 1, 1], [], []>} : vector<16x256xbf16>, vector<256x784xbf16>, vector<16x784xf32> -> vector<16x784xf32>
    %c0_19 = arith.constant 0 : index
    %c0_20 = arith.constant 0 : index
    %39 = vector.load %arg7[%c0_19, %c0_20] : memref<1x784xf32, #tpu.memory_space<vmem>>, vector<1x784xf32>
    %40 = vector.broadcast %39 : vector<1x784xf32> to vector<16x784xf32>
    %41 = arith.addf %38, %40 : vector<16x784xf32>
    %cst_21 = arith.constant 5.000000e-01 : f32
    %42 = vector.broadcast %cst_21 : f32 to vector<16x784xf32>
    %43 = arith.mulf %42, %41 : vector<16x784xf32>
    %44 = math.tanh %43 : vector<16x784xf32>
    %cst_22 = arith.constant 1.000000e+00 : f32
    %45 = vector.broadcast %cst_22 : f32 to vector<16x784xf32>
    %46 = arith.addf %45, %44 : vector<16x784xf32>
    %cst_23 = arith.constant 5.000000e-01 : f32
    %47 = vector.broadcast %cst_23 : f32 to vector<16x784xf32>
    %48 = arith.mulf %47, %46 : vector<16x784xf32>
    %49 = arith.truncf %48 : vector<16x784xf32> to vector<16x784xbf16>
    %c0_24 = arith.constant 0 : index
    %c0_25 = arith.constant 0 : index
    %50 = vector.load %arg8[%c0_24, %c0_25] : memref<16x784xbf16, #tpu.memory_space<vmem>>, vector<16x784xbf16>
    tpu.vector_store %arg8[%c0_24, %c0_25], %49 {strides = array<i32>} : memref<16x784xbf16, #tpu.memory_space<vmem>>, vector<16x784xbf16>,
    return
  }
  func.func @transform_0(%arg0: i32) -> (i32, i32) {
    %c0_i32 = arith.constant 0 : i32
    %c0_i32_0 = arith.constant 0 : i32
    return %arg0, %c0_i32 : i32, i32
  }
  func.func @transform_1(%arg0: i32) -> (i32, i32) {
    %c0_i32 = arith.constant 0 : i32
    %c0_i32_0 = arith.constant 0 : i32
    %c0_i32_1 = arith.constant 0 : i32
    return %c0_i32, %c0_i32_0 : i32, i32
  }
  func.func @transform_2(%arg0: i32) -> (i32, i32) {
    %c0_i32 = arith.constant 0 : i32
    %c0_i32_0 = arith.constant 0 : i32
    %c0_i32_1 = arith.constant 0 : i32
    return %c0_i32, %c0_i32_0 : i32, i32
  }
  func.func @transform_3(%arg0: i32) -> (i32, i32) {
    %c0_i32 = arith.constant 0 : i32
    %c0_i32_0 = arith.constant 0 : i32
    %c0_i32_1 = arith.constant 0 : i32
    return %c0_i32, %c0_i32_0 : i32, i32
  }
  func.func @transform_4(%arg0: i32) -> (i32, i32) {
    %c0_i32 = arith.constant 0 : i32
    %c0_i32_0 = arith.constant 0 : i32
    %c0_i32_1 = arith.constant 0 : i32
    return %c0_i32, %c0_i32_0 : i32, i32
  }
  func.func @transform_5(%arg0: i32) -> (i32, i32) {
    %c0_i32 = arith.constant 0 : i32
    %c0_i32_0 = arith.constant 0 : i32
    %c0_i32_1 = arith.constant 0 : i32
    return %c0_i32, %c0_i32_0 : i32, i32
  }
  func.func @transform_6(%arg0: i32) -> (i32, i32) {
    %c0_i32 = arith.constant 0 : i32
    %c0_i32_0 = arith.constant 0 : i32
    %c0_i32_1 = arith.constant 0 : i32
    return %c0_i32, %c0_i32_0 : i32, i32
  }
  func.func @transform_7(%arg0: i32) -> (i32, i32) {
    %c0_i32 = arith.constant 0 : i32
    %c0_i32_0 = arith.constant 0 : i32
    return %arg0, %c0_i32 : i32, i32
  }
}

</mosaic_0001>

<bundles_post_ra>
// kernel: tpu_custom_call.1
= control target key start
LH: loop header
LB: loop body
LE: loop exit
PB: predicated region body
PF: predicated region fallthrough
CT: control target
= control target key end

     0   :  { %v1710_v2 = vmov 0   ;;  %s2228_s0 = inlined_call_operand.vmem [shape: f32[16,128], index: 0, kind: input, shape index: {}]   ;;  %s2229_s1 = inlined_call_operand.vmem [shape: bf16[128,256], index: 1, kind: input, shape index: {}]   ;;  %s2230_s2 = inlined_call_operand.vmem [shape: f32[1,256], index: 2, kind: input, shape index: {}]   ;;  %s2231_s3 = inlined_call_operand.vmem [shape: f32[1,256], index: 3, kind: input, shape index: {}]   ;;  %s2232_s4 = inlined_call_operand.vmem [shape: f32[1,256], index: 4, kind: input, shape index: {}]   ;;  %s2233_s5 = inlined_call_operand.vmem [shape: bf16[256,784], index: 5, kind: input, shape index: {}]   ;;  %s2234_s6 = inlined_call_operand.vmem [shape: f32[1,784], index: 6, kind: input, shape index: {}]   ;;  %s2235_s7 = inlined_call_operand.hbm [shape: bf16[16,784], index: 7, kind: output, shape index: {}]  }
   0x1   :  { %v1470_v0 = vld [vmem:[%s2229_s1 + $0x4] ss:$8 sps:$4 sm:$0xff]   ;;  %v1472_v1 = vld [vmem:[%s2229_s1] ss:$8 sps:$4 sm:$0xff]   ;;  %171 = vmatprep.mubr.bf16.mxu0 %v1710_v2  ;;  %v1473_v3 = vld [vmem:[%s2229_s1 + $0x14] ss:$8 sps:$4 sm:$0xff]  }
   0x2   :  { %139 = vmatprep.subr.bf16.mxu0 %v1470_v0  ;;  %v1475_v4 = vld [vmem:[%s2229_s1 + $0x10] ss:$8 sps:$4 sm:$0xff]   ;;  %v1476_v5 = vld [vmem:[%s2229_s1 + $0x24] ss:$8 sps:$4 sm:$0xff]   ;;  %v1478_v6 = vld [vmem:[%s2229_s1 + $0x20] ss:$8 sps:$4 sm:$0xff]  }
   0x3   :  { %140 = vmatpush1.bf16.msra.mxu0 %v1472_v1  ;;  %v1479_v7 = vld [vmem:[%s2229_s1 + $0x34] ss:$8 sps:$4 sm:$0xff]   ;;  %v1481_v8 = vld [vmem:[%s2229_s1 + $0x30] ss:$8 sps:$4 sm:$0xff]   ;;  %v1482_v9 = vld [vmem:[%s2229_s1 + $0x44] ss:$8 sps:$4 sm:$0xff]  }
   0x4   :  { %141 = vmatprep.subr.bf16.mxu0 %v1473_v3  ;;  %v1484_v10 = vld [vmem:[%s2229_s1 + $0x40] ss:$8 sps:$4 sm:$0xff]   ;;  %v1485_v11 = vld [vmem:[%s2229_s1 + $0x54] ss:$8 sps:$4 sm:$0xff]   ;;  %v1487_v12 = vld [vmem:[%s2229_s1 + $0x50] ss:$8 sps:$4 sm:$0xff]  }
   0x5   :  { %v1488_v13 = vld [vmem:[%s2229_s1 + $0x64] ss:$8 sps:$4 sm:$0xff]   ;;  %v1490_v14 = vld [vmem:[%s2229_s1 + $0x60] ss:$8 sps:$4 sm:$0xff]   ;;  %v1491_v15 = vld [vmem:[%s2229_s1 + $0x74] ss:$8 sps:$4 sm:$0xff]  }
   0x6   :  { %v1493_v16 = vld [vmem:[%s2229_s1 + $0x70] ss:$8 sps:$4 sm:$0xff]   ;;  %v28_v17 = vld [vmem:[%s2228_s0] sm:$0xff]  ;;  %v29_v18 = vld [vmem:[%s2228_s0 + $0x8] sm:$0xff] }
   0x7   :  { %142 = vmatpush1.bf16.msra.mxu0 %v1475_v4  ;;  %v30_v19 = vpack.c.bf16 %v29_v18, %v28_v17 }
   0x8   :  { %143 = vmatprep.subr.bf16.mxu0 %v1476_v5 }
   0xb   :  { %144 = vmatpush1.bf16.msra.mxu0 %v1478_v6 }
   0xc   :  { %145 = vmatprep.subr.bf16.mxu0 %v1479_v7 }
   0xf   :  { %146 = vmatpush1.bf16.msra.mxu0 %v1481_v8 }
  0x10   :  { %147 = vmatprep.subr.bf16.mxu0 %v1482_v9 }
  0x13   :  { %148 = vmatpush1.bf16.msra.mxu0 %v1484_v10 }
  0x14   :  { %149 = vmatprep.subr.bf16.mxu0 %v1485_v11 }
  0x17   :  { %150 = vmatpush1.bf16.msra.mxu0 %v1487_v12 }
  0x18   :  { %151 = vmatprep.subr.bf16.mxu0 %v1488_v13 }
  0x1b   :  { %152 = vmatpush1.bf16.msra.mxu0 %v1490_v14 }
  0x1c   :  { %153 = vmatprep.subr.bf16.mxu0 %v1491_v15 }
  0x1f   :  { %154 = vmatpush1.bf16.msra.mxu0 %v1493_v16 }
  0x22   :  { %172 = vmatmul.mubr.bf16.vlgmr.msra.gmra.mrb[0].mxu0 %v30_v19 }
  0x23   :  { %12 = vsyncpa [#allocation3], 0  ;;  %v1494_v20 = vld [vmem:[%s2233_s5 + $0x4] ss:$28 sps:$4 sm:$0xff]   ;;  %v1498_v22 = vld [vmem:[%s2233_s5 + $0xc] ss:$28 sps:$4 sm:$0xff]   ;;  %v49_v55 = vlaneseq }
  0x24   :  { %v1496_v21 = vld [vmem:[%s2233_s5 + $0x8] ss:$28 sps:$4 sm:$0xff]   ;;  %v1499_v23 = vld [vmem:[%s2233_s5] ss:$28 sps:$4 sm:$0xff]   ;;  %1005 = vmatprep.subr.bf16.mxu1 %v1494_v20  ;;  %1048 = vmatprep.subr.bf16.mxu0 %v1498_v22  ;;  %v1505_v27 = vld [vmem:[%s2233_s5 + $0x38] ss:$28 sps:$4 sm:$0xff]  }
  0x25   :  { %v1500_v24 = vld [vmem:[%s2233_s5 + $0x3c] ss:$28 sps:$4 sm:$0xff]   ;;  %v1504_v25 = vld [vmem:[%s2233_s5 + $0x44] ss:$28 sps:$4 sm:$0xff]   ;;  %1006 = vmatpush1.bf16.msra.mxu1 %v1499_v23  ;;  %1049 = vmatpush1.bf16.msra.mxu0 %v1496_v21  ;;  %v1506_v28 = vld [vmem:[%s2233_s5 + $0x74] ss:$28 sps:$4 sm:$0xff]  }
  0x26   :  { %v1502_v26 = vld [vmem:[%s2233_s5 + $0x40] ss:$28 sps:$4 sm:$0xff]   ;;  %1007 = vmatprep.subr.bf16.mxu1 %v1500_v24  ;;  %1050 = vmatprep.subr.bf16.mxu0 %v1504_v25  ;;  %v1508_v30 = vld [vmem:[%s2233_s5 + $0x78] ss:$28 sps:$4 sm:$0xff]   ;;  %v1511_v31 = vld [vmem:[%s2233_s5 + $0x70] ss:$28 sps:$4 sm:$0xff]  }
  0x27   :  { %v1510_v29 = vld [vmem:[%s2233_s5 + $0x7c] ss:$28 sps:$4 sm:$0xff]   ;;  %v1512_v32 = vld [vmem:[%s2233_s5 + $0xac] ss:$28 sps:$4 sm:$0xff]   ;;  %v1516_v33 = vld [vmem:[%s2233_s5 + $0xb4] ss:$28 sps:$4 sm:$0xff]  }
  0x28   :  { %v1514_v34 = vld [vmem:[%s2233_s5 + $0xb0] ss:$28 sps:$4 sm:$0xff]   ;;  %v1517_v35 = vld [vmem:[%s2233_s5 + $0xa8] ss:$28 sps:$4 sm:$0xff]   ;;  %v1523_v39 = vld [vmem:[%s2233_s5 + $0xe0] ss:$28 sps:$4 sm:$0xff]  }
  0x29   :  { %1008 = vmatpush1.bf16.msra.mxu1 %v1505_v27  ;;  %1051 = vmatpush1.bf16.msra.mxu0 %v1502_v26  ;;  %v1518_v36 = vld [vmem:[%s2233_s5 + $0xe4] ss:$28 sps:$4 sm:$0xff]   ;;  %v1522_v37 = vld [vmem:[%s2233_s5 + $0xec] ss:$28 sps:$4 sm:$0xff]   ;;  %v1524_v40 = vld [vmem:[%s2233_s5 + $0x11c] ss:$28 sps:$4 sm:$0xff]  }
  0x2a   :  { %1009 = vmatprep.subr.bf16.mxu1 %v1506_v28  ;;  %1052 = vmatprep.subr.bf16.mxu0 %v1510_v29  ;;  %v1520_v38 = vld [vmem:[%s2233_s5 + $0xe8] ss:$28 sps:$4 sm:$0xff]   ;;  %v1526_v42 = vld [vmem:[%s2233_s5 + $0x120] ss:$28 sps:$4 sm:$0xff]   ;;  %v1529_v43 = vld [vmem:[%s2233_s5 + $0x118] ss:$28 sps:$4 sm:$0xff]  }
  0x2b   :  { %v1528_v41 = vld [vmem:[%s2233_s5 + $0x124] ss:$28 sps:$4 sm:$0xff]   ;;  %v1530_v44 = vld [vmem:[%s2233_s5 + $0x154] ss:$28 sps:$4 sm:$0xff]   ;;  %v1534_v45 = vld [vmem:[%s2233_s5 + $0x15c] ss:$28 sps:$4 sm:$0xff]  }
  0x2c   :  { %v1532_v46 = vld [vmem:[%s2233_s5 + $0x158] ss:$28 sps:$4 sm:$0xff]   ;;  %v1535_v47 = vld [vmem:[%s2233_s5 + $0x150] ss:$28 sps:$4 sm:$0xff]   ;;  %v1541_v51 = vld [vmem:[%s2233_s5 + $0x188] ss:$28 sps:$4 sm:$0xff]  }
  0x2d   :  { %1010 = vmatpush1.bf16.msra.mxu1 %v1511_v31  ;;  %1053 = vmatpush1.bf16.msra.mxu0 %v1508_v30  ;;  %v1536_v48 = vld [vmem:[%s2233_s5 + $0x18c] ss:$28 sps:$4 sm:$0xff]   ;;  %v1540_v49 = vld [vmem:[%s2233_s5 + $0x194] ss:$28 sps:$4 sm:$0xff]   ;;  %v1542_v52 = vld [vmem:[%s2233_s5 + $0x1c4] ss:$28 sps:$4 sm:$0xff]  }
  0x2e   :  { %1011 = vmatprep.subr.bf16.mxu1 %v1512_v32  ;;  %1054 = vmatprep.subr.bf16.mxu0 %v1516_v33  ;;  %v1538_v50 = vld [vmem:[%s2233_s5 + $0x190] ss:$28 sps:$4 sm:$0xff]   ;;  %v1544_v54 = vld [vmem:[%s2233_s5 + $0x1c8] ss:$28 sps:$4 sm:$0xff]   ;;  %v1913_v56 = vshrl.u32 %v49_v55, 7  ;;  %vm1278_vm4 = vcmask 125952  }
  0x2f   :  { %v1546_v53 = vld [vmem:[%s2233_s5 + $0x1cc] ss:$28 sps:$4 sm:$0xff]   ;;  %v47_v58 = vld [vmem:[%s2230_s2] sm:$0x3]  ;;  %v1548_v23 = vld [vmem:[%s2233_s5 + $0x1fc] ss:$28 sps:$4 sm:$0xff]  }
  0x30   :  { %v1916_v57 = vsub.s32 0, %v1913_v56  ;;  %v1922_v59 = vsub.s32 1, %v1913_v56  ;;  %v1547_v22 = vld [vmem:[%s2233_s5 + $0x1c0] ss:$28 sps:$4 sm:$0xff]   ;;  %v1553_v26 = vld [vmem:[%s2233_s5 + $0x1f8] ss:$28 sps:$4 sm:$0xff]  }
  0x31   :  { %1012 = vmatpush1.bf16.msra.mxu1 %v1517_v35  ;;  %1055 = vmatpush1.bf16.msra.mxu0 %v1514_v34  ;;  %v1552_v24 = vld [vmem:[%s2233_s5 + $0x204] ss:$28 sps:$4 sm:$0xff]   ;;  %v1554_v27 = vld [vmem:[%s2233_s5 + $0x234] ss:$28 sps:$4 sm:$0xff]   ;;  %v1558_v28 = vld [vmem:[%s2233_s5 + $0x23c] ss:$28 sps:$4 sm:$0xff]  }
  0x32   :  { %1013 = vmatprep.subr.bf16.mxu1 %v1518_v36  ;;  %1056 = vmatprep.subr.bf16.mxu0 %v1522_v37  ;;  %v52_v60 = vrot.slane %v47_v58, %v1916_v57  ;;  %v56_v61 = vrot.slane %v47_v58, %v1922_v59  ;;  %v1550_v25 = vld [vmem:[%s2233_s5 + $0x200] ss:$28 sps:$4 sm:$0xff]   ;;  %v1556_v29 = vld [vmem:[%s2233_s5 + $0x238] ss:$28 sps:$4 sm:$0xff]   ;;  %v1559_v30 = vld [vmem:[%s2233_s5 + $0x230] ss:$28 sps:$4 sm:$0xff]  }
  0x33   :  { %v1560_v31 = vld [vmem:[%s2233_s5 + $0x26c] ss:$28 sps:$4 sm:$0xff]   ;;  %v1564_v32 = vld [vmem:[%s2233_s5 + $0x274] ss:$28 sps:$4 sm:$0xff]   ;;  %v1566_v35 = vld [vmem:[%s2233_s5 + $0x2a4] ss:$28 sps:$4 sm:$0xff]  }
  0x34   :  { %v1562_v33 = vld [vmem:[%s2233_s5 + $0x270] ss:$28 sps:$4 sm:$0xff]   ;;  %v1565_v34 = vld [vmem:[%s2233_s5 + $0x268] ss:$28 sps:$4 sm:$0xff]  }
  0x35   :  { %1014 = vmatpush1.bf16.msra.mxu1 %v1523_v39  ;;  %1057 = vmatpush1.bf16.msra.mxu0 %v1520_v38  ;;  %v1568_v36 = vld [vmem:[%s2233_s5 + $0x2a8] ss:$28 sps:$4 sm:$0xff]   ;;  %v1571_v38 = vld [vmem:[%s2233_s5 + $0x2a0] ss:$28 sps:$4 sm:$0xff]  }
  0x36   :  { %1015 = vmatprep.subr.bf16.mxu1 %v1524_v40  ;;  %1058 = vmatprep.subr.bf16.mxu0 %v1528_v41  ;;  %v1570_v37 = vld [vmem:[%s2233_s5 + $0x2ac] ss:$28 sps:$4 sm:$0xff]   ;;  %v1572_v39 = vld [vmem:[%s2233_s5 + $0x2dc] ss:$28 sps:$4 sm:$0xff]   ;;  %v1576_v40 = vld [vmem:[%s2233_s5 + $0x2e4] ss:$28 sps:$4 sm:$0xff]  }
  0x37   :  { %v1574_v41 = vld [vmem:[%s2233_s5 + $0x2e0] ss:$28 sps:$4 sm:$0xff]  }
  0x39   :  { %1016 = vmatpush1.bf16.msra.mxu1 %v1529_v43  ;;  %1059 = vmatpush1.bf16.msra.mxu0 %v1526_v42  ;;  %v1577_v42 = vld [vmem:[%s2233_s5 + $0x2d8] ss:$28 sps:$4 sm:$0xff]  }
  0x3a   :  { %1017 = vmatprep.subr.bf16.mxu1 %v1530_v44  ;;  %1060 = vmatprep.subr.bf16.mxu0 %v1534_v45  ;;  %v1578_v43 = vld [vmem:[%s2233_s5 + $0x314] ss:$28 sps:$4 sm:$0xff]   ;;  %v1582_v44 = vld [vmem:[%s2233_s5 + $0x31c] ss:$28 sps:$4 sm:$0xff]  }
  0x3b   :  { %v1580_v45 = vld [vmem:[%s2233_s5 + $0x318] ss:$28 sps:$4 sm:$0xff]  }
  0x3d   :  { %1018 = vmatpush1.bf16.msra.mxu1 %v1535_v47  ;;  %1061 = vmatpush1.bf16.msra.mxu0 %v1532_v46  ;;  %v1583_v46 = vld [vmem:[%s2233_s5 + $0x310] ss:$28 sps:$4 sm:$0xff]  }
  0x3e   :  { %1019 = vmatprep.subr.bf16.mxu1 %v1536_v48  ;;  %1062 = vmatprep.subr.bf16.mxu0 %v1540_v49  ;;  %v1584_v47 = vld [vmem:[%s2233_s5 + $0x34c] ss:$28 sps:$4 sm:$0xff]   ;;  %v1588_v48 = vld [vmem:[%s2233_s5 + $0x354] ss:$28 sps:$4 sm:$0xff]  }
  0x3f   :  { %v1586_v49 = vld [vmem:[%s2233_s5 + $0x350] ss:$28 sps:$4 sm:$0xff]  }
  0x41   :  { %1020 = vmatpush1.bf16.msra.mxu1 %v1541_v51  ;;  %1063 = vmatpush1.bf16.msra.mxu0 %v1538_v50  ;;  %v1589_v50 = vld [vmem:[%s2233_s5 + $0x348] ss:$28 sps:$4 sm:$0xff]   ;;  %v1592_v51 = vld [vmem:[%s2233_s5 + $0x14] ss:$28 sps:$4 sm:$0xff]  }
  0x42   :  { %1021 = vmatprep.subr.bf16.mxu1 %v1542_v52  ;;  %1064 = vmatprep.subr.bf16.mxu0 %v1546_v53  ;;  %v1593_v52 = vld [vmem:[%s2233_s5 + $0x1d8] ss:$28 sps:$4 sm:$0xff]  }
  0x45   :  { %1065 = vmatpush1.bf16.msra.mxu0 %v1544_v54  ;;  %1022 = vmatpush1.bf16.msra.mxu1 %v1547_v22 }
  0x46   :  { %1023 = vmatprep.subr.bf16.mxu1 %v1548_v23  ;;  %1066 = vmatprep.subr.bf16.mxu0 %v1552_v24 }
  0x49   :  { %1024 = vmatpush1.bf16.msra.mxu1 %v1553_v26  ;;  %1067 = vmatpush1.bf16.msra.mxu0 %v1550_v25 }
  0x4a   :  { %1025 = vmatprep.subr.bf16.mxu1 %v1554_v27  ;;  %1068 = vmatprep.subr.bf16.mxu0 %v1558_v28 }
  0x4d   :  { %1026 = vmatpush1.bf16.msra.mxu1 %v1559_v30  ;;  %1069 = vmatpush1.bf16.msra.mxu0 %v1556_v29 }
  0x4e   :  { %1027 = vmatprep.subr.bf16.mxu1 %v1560_v31  ;;  %1070 = vmatprep.subr.bf16.mxu0 %v1564_v32 }
  0x51   :  { %1028 = vmatpush1.bf16.msra.mxu1 %v1565_v34  ;;  %1071 = vmatpush1.bf16.msra.mxu0 %v1562_v33  ;;  %v1594_v33 = vld [vmem:[%s2233_s5 + $0x18] ss:$28 sps:$4 sm:$0xff]   ;;  %v1597_v34 = vld [vmem:[%s2233_s5 + $0x4c] ss:$28 sps:$4 sm:$0xff]  }
  0x52   :  { %1029 = vmatprep.subr.bf16.mxu1 %v1566_v35  ;;  %1072 = vmatprep.subr.bf16.mxu0 %v1570_v37  ;;  %v1598_v35 = vld [vmem:[%s2233_s5 + $0x210] ss:$28 sps:$4 sm:$0xff]  }
  0x53   :  { %v1599_v37 = vld [vmem:[%s2233_s5 + $0x50] ss:$28 sps:$4 sm:$0xff]  }
  0x55   :  { %1030 = vmatpush1.bf16.msra.mxu1 %v1571_v38  ;;  %1073 = vmatpush1.bf16.msra.mxu0 %v1568_v36  ;;  %v1595_v36 = vld [vmem:[%s2233_s5 + $0x48] ss:$28 sps:$4 sm:$0xff]  }
  0x56   :  { %1031 = vmatprep.subr.bf16.mxu1 %v1572_v39  ;;  %1074 = vmatprep.subr.bf16.mxu0 %v1576_v40  ;;  %v1602_v38 = vld [vmem:[%s2233_s5 + $0x84] ss:$28 sps:$4 sm:$0xff]  }
  0x57   :  { %v1603_v39 = vld [vmem:[%s2233_s5 + $0x248] ss:$28 sps:$4 sm:$0xff]   ;;  %v1600_v40 = vld [vmem:[%s2233_s5 + $0x80] ss:$28 sps:$4 sm:$0xff]  }
  0x59   :  { %1032 = vmatpush1.bf16.msra.mxu1 %v1577_v42  ;;  %1075 = vmatpush1.bf16.msra.mxu0 %v1574_v41  ;;  %v1604_v41 = vld [vmem:[%s2233_s5 + $0x88] ss:$28 sps:$4 sm:$0xff]   ;;  %v1607_v42 = vld [vmem:[%s2233_s5 + $0xbc] ss:$28 sps:$4 sm:$0xff]  }
  0x5a   :  { %1033 = vmatprep.subr.bf16.mxu1 %v1578_v43  ;;  %1076 = vmatprep.subr.bf16.mxu0 %v1582_v44  ;;  %v1608_v43 = vld [vmem:[%s2233_s5 + $0x280] ss:$28 sps:$4 sm:$0xff]   ;;  %v1605_v44 = vld [vmem:[%s2233_s5 + $0xb8] ss:$28 sps:$4 sm:$0xff]  }
  0x5d   :  { %1034 = vmatpush1.bf16.msra.mxu1 %v1583_v46  ;;  %1077 = vmatpush1.bf16.msra.mxu0 %v1580_v45  ;;  %v1609_v45 = vld [vmem:[%s2233_s5 + $0xc0] ss:$28 sps:$4 sm:$0xff]   ;;  %v1612_v46 = vld [vmem:[%s2233_s5 + $0xf4] ss:$28 sps:$4 sm:$0xff]  }
  0x5e   :  { %1035 = vmatprep.subr.bf16.mxu1 %v1584_v47  ;;  %1078 = vmatprep.subr.bf16.mxu0 %v1588_v48  ;;  %v1613_v47 = vld [vmem:[%s2233_s5 + $0x2b8] ss:$28 sps:$4 sm:$0xff]   ;;  %v1610_v48 = vld [vmem:[%s2233_s5 + $0xf0] ss:$28 sps:$4 sm:$0xff]  }
  0x61   :  { %1036 = vmatpush1.bf16.msra.mxu1 %v1589_v50  ;;  %1079 = vmatpush1.bf16.msra.mxu0 %v1586_v49  ;;  %v1614_v49 = vld [vmem:[%s2233_s5 + $0xf8] ss:$28 sps:$4 sm:$0xff]   ;;  %v1617_v50 = vld [vmem:[%s2233_s5 + $0x12c] ss:$28 sps:$4 sm:$0xff]  }
  0x62   :  { %1091 = vmatprep.subr.bf16.mxu1 %v1592_v51  ;;  %1444 = vmatprep.subr.bf16.mxu0 %v1593_v52  ;;  %v1618_v51 = vld [vmem:[%s2233_s5 + $0x2f0] ss:$28 sps:$4 sm:$0xff]   ;;  %v1615_v52 = vld [vmem:[%s2233_s5 + $0x128] ss:$28 sps:$4 sm:$0xff]  }
  0xf5   :  { %v173_v62 = vpop.f32.mrb[0].mxu0 }
  0xf6   :  { %v174_v63 = vadd.f32 %v173_v62, %v52_v60  ;;  %v175_v0 = vpop.f32.mrb[1].mxu0 }
  0xf7   :  { %v176_v1 = vadd.f32 %v175_v0, %v56_v61  ;;  %v177_v2 = vpop.f32.mrb[2].mxu0 }
  0xf8   :  { %v186_v3 = vmul.f32 0.02, %v174_v63  ;;  %v178_v4 = vadd.f32 %v177_v2, %v52_v60  ;;  %v179_v5 = vpop.f32.mrb[3].mxu0  ;;  %vm182_vm0 = vcmp.gt.f32.partialorder %v174_v63, 0.0 }
  0xf9   :  { %v187_v6 = vmul.f32 0.02, %v176_v1  ;;  %v180_v7 = vadd.f32 %v179_v5, %v56_v61  ;;  %vm183_vm1 = vcmp.gt.f32.partialorder %v176_v1, 0.0 }
  0xfa   :  { %vm184_vm2 = vcmp.gt.f32.partialorder %v178_v4, 0.0  ;;  %v188_v8 = vmul.f32 0.02, %v178_v4  ;;  %v1926_v9 = vsel %vm182_vm0, %v174_v63, %v186_v3 }
  0xfb   :  { %vm185_vm3 = vcmp.gt.f32.partialorder %v180_v7, 0.0  ;;  %v189_v10 = vmul.f32 0.02, %v180_v7  ;;  %v1928_v11 = vsel %vm183_vm1, %v176_v1, %v187_v6  ;;  %v200_v12 = vmul.f32 %v1926_v9, %v1926_v9  ;;  %v230_v6 = vld [vmem:[%s2231_s3] sm:$0x3] }
  0xfc   :  { %v194_v13 = vadd.f32 %v1928_v11, %v1926_v9  ;;  %v201_v14 = vmul.f32 %v1928_v11, %v1928_v11  ;;  %v1936_v15 = vsel %vm184_vm2, %v178_v4, %v188_v8 }
  0xfd   :  { %v1938_v16 = vsel %vm185_vm3, %v180_v7, %v189_v10  ;;  %v202_v18 = vmul.f32 %v1936_v15, %v1936_v15 }
  0xfe   :  { %195 = vadd.xlane.f32.xlu0 %v194_v13  ;;  %v204_v17 = vadd.f32 %v201_v14, %v200_v12  ;;  %v203_v19 = vmul.f32 %v1938_v16, %v1938_v16  ;;  %v197_v20 = vadd.f32 %v1938_v16, %v1936_v15  ;;  %v239_v13 = vrot.slane %v230_v6, %v1922_v59  ;;  %v246_v14 = vld [vmem:[%s2232_s4] sm:$0x3] }
  0xff   :  { %v255_v22 = vrot.slane %v246_v14, %v1922_v59 }
 0x100   :  { %205 = vadd.xlane.f32.xlu1 %v204_v17  ;;  %v207_v21 = vadd.f32 %v203_v19, %v202_v18  ;;  %v235_v18 = vrot.slane %v230_v6, %v1916_v57  ;;  %v1636_v6 = vld [vmem:[%s2233_s5 + $0x240] ss:$28 sps:$4 sm:$0xff]  }
 0x102   :  { %198 = vadd.xlane.f32.xlu0 %v197_v20 }
 0x104   :  { %208 = vadd.xlane.f32.xlu1 %v207_v21 }
 0x18b   :  { %v196_v53 = vpop.xlane.xlu0 %195 }
 0x18c   :  { %v210_v54 = vmul.f32 0.005, %v196_v53  ;;  %v1619_v53 = vld [vmem:[%s2233_s5 + $0x130] ss:$28 sps:$4 sm:$0xff]  }
 0x18d   :  { %v206_v55 = vpop.xlane.xlu1 %205 }
 0x18e   :  { %v212_v58 = vmul.f32 0.005, %v206_v55  ;;  %v214_v60 = vmul.f32 %v210_v54, %v210_v54  ;;  %v218_v8 = vsub.f32 %v1926_v9, %v210_v54  ;;  %v219_v10 = vsub.f32 %v1928_v11, %v210_v54  ;;  %v1622_v54 = vld [vmem:[%s2233_s5 + $0x164] ss:$28 sps:$4 sm:$0xff]  }
 0x18f   :  { %v199_v61 = vpop.xlane.xlu0 %198  ;;  %v251_v9 = vrot.slane %v246_v14, %v1916_v57  ;;  %v1623_v55 = vld [vmem:[%s2233_s5 + $0x328] ss:$28 sps:$4 sm:$0xff]  }
 0x190   :  { %v216_v62 = vsub.f32 %v212_v58, %v214_v60  ;;  %v211_v63 = vmul.f32 0.005, %v199_v61  ;;  %v1620_v58 = vld [vmem:[%s2233_s5 + $0x160] ss:$28 sps:$4 sm:$0xff]   ;;  %v1624_v60 = vld [vmem:[%s2233_s5 + $0x168] ss:$28 sps:$4 sm:$0xff]  }
 0x191   :  { %v209_v0 = vpop.xlane.xlu1 %208  ;;  %v1627_v61 = vld [vmem:[%s2233_s5 + $0x19c] ss:$28 sps:$4 sm:$0xff]   ;;  %v1645_v14 = vld [vmem:[%s2233_s5 + $0x2e8] ss:$28 sps:$4 sm:$0xff]  }
 0x192   :  { %v222_v1 = vadd.f32 1e-05, %v216_v62  ;;  %v213_v2 = vmul.f32 0.005, %v209_v0  ;;  %v215_v3 = vmul.f32 %v211_v63, %v211_v63  ;;  %v220_v19 = vsub.f32 %v1936_v15, %v211_v63  ;;  %v1590_v15 = vld [vmem:[%s2233_s5 + $0x10] ss:$28 sps:$4 sm:$0xff]  }
 0x193   :  { %v221_v20 = vsub.f32 %v1938_v16, %v211_v63  ;;  %v1628_v62 = vld [vmem:[%s2233_s5 + $0x360] ss:$28 sps:$4 sm:$0xff]   ;;  %v1625_v63 = vld [vmem:[%s2233_s5 + $0x198] ss:$28 sps:$4 sm:$0xff]  }
 0x194   :  { %1654 = vrsqrt.f32 %v222_v1  ;;  %v217_v4 = vsub.f32 %v213_v2, %v215_v3  ;;  %v1629_v0 = vld [vmem:[%s2233_s5 + $0x1a0] ss:$28 sps:$4 sm:$0xff]   ;;  %v1632_v1 = vld [vmem:[%s2233_s5 + $0x1d4] ss:$28 sps:$4 sm:$0xff]   ;;  %v1635_v3 = vld [vmem:[%s2233_s5 + $0x20c] ss:$28 sps:$4 sm:$0xff]  }
 0x195   :  { %v1630_v2 = vld [vmem:[%s2233_s5 + $0x1d0] ss:$28 sps:$4 sm:$0xff]  }
 0x196   :  { %v223_v5 = vadd.f32 1e-05, %v217_v4  ;;  %v1633_v4 = vld [vmem:[%s2233_s5 + $0x208] ss:$28 sps:$4 sm:$0xff]  }
 0x198   :  { %1656 = vrsqrt.f32 %v223_v5  ;;  %v1638_v5 = vld [vmem:[%s2233_s5 + $0x244] ss:$28 sps:$4 sm:$0xff]  }
 0x19e   :  { %v1655_v7 = vpop.eup %1654 }
 0x19f   :  { %v227_v12 = vmul.f32 %v1655_v7, %v219_v10  ;;  %v226_v17 = vmul.f32 %v1655_v7, %v218_v8  ;;  %v1641_v7 = vld [vmem:[%s2233_s5 + $0x27c] ss:$28 sps:$4 sm:$0xff]   ;;  %v1644_v10 = vld [vmem:[%s2233_s5 + $0x2b4] ss:$28 sps:$4 sm:$0xff]  }
 0x1a0   :  { %v1639_v8 = vld [vmem:[%s2233_s5 + $0x278] ss:$28 sps:$4 sm:$0xff]  }
 0x1a1   :  { %v243_v23 = vmul.f32 %v239_v13, %v227_v12  ;;  %v242_v25 = vmul.f32 %v235_v18, %v226_v17  ;;  %v1642_v12 = vld [vmem:[%s2233_s5 + $0x2b0] ss:$28 sps:$4 sm:$0xff]   ;;  %v1650_v17 = vld [vmem:[%s2233_s5 + $0x324] ss:$28 sps:$4 sm:$0xff]  }
 0x1a2   :  { %v1657_v21 = vpop.eup %1656 }
 0x1a3   :  { %v229_v11 = vmul.f32 %v1657_v21, %v221_v20  ;;  %v228_v24 = vmul.f32 %v1657_v21, %v220_v19  ;;  %v259_v28 = vadd.f32 %v255_v22, %v243_v23  ;;  %v258_v30 = vadd.f32 %v251_v9, %v242_v25  ;;  %v1653_v19 = vld [vmem:[%s2233_s5 + $0x35c] ss:$28 sps:$4 sm:$0xff]  }
 0x1a4   :  { %v1651_v20 = vld [vmem:[%s2233_s5 + $0x358] ss:$28 sps:$4 sm:$0xff]   ;;  %v404_v21 = vsub.s32 2, %v1913_v56 }
 0x1a5   :  { %v245_v26 = vmul.f32 %v239_v13, %v229_v11  ;;  %v244_v27 = vmul.f32 %v235_v18, %v228_v24  ;;  %v1647_v13 = vld [vmem:[%s2233_s5 + $0x2ec] ss:$28 sps:$4 sm:$0xff]   ;;  %v1648_v18 = vld [vmem:[%s2233_s5 + $0x320] ss:$28 sps:$4 sm:$0xff]   ;;  %s1711_s5 = smov [#allocation2]  }
 0x1a7   :  { %v261_v29 = vadd.f32 %v255_v22, %v245_v26  ;;  %v260_v31 = vadd.f32 %v251_v9, %v244_v27  ;;  %v2201_v22 = vld [vmem:[%s2234_s6] sm:$0x7f]  ;;  %v408_v9 = vsub.s32 3, %v1913_v56  ;;  %s1289_s6 = sshll.u32 %s1711_s5, 4  ;;  %s1290_s6 = int_to_ptr.vmem [resolvable:$true] %s1289_s6 }
 0x1a8   :  { %v397_v11 = vrot.slane %v2201_v22, %v1916_v57  ;;  %v405_v23 = vrot.slane %v2201_v22, %v404_v21  ;;  %v401_v24 = vrot.slane %v2201_v22, %v1922_v59  ;;  %s1686_s30 = scalar_lea.vmem %s1290_s6, 896  ;;  %p1691_p1 = scmp.lt.s32.totalorder %s1290_s6, %s1290_s6 }
 0x1a9   :  { %v263_v32 = vpack.c.bf16 %v261_v29, %v259_v28  ;;  %v2056_v16 = vpack.c.bf16 %v260_v31, %v258_v30  ;;  %v409_v25 = vrot.slane %v2201_v22, %v408_v9  ;;  %p1687_p0 = scmp.ne.s32.totalorder %s1290_s6, %s1686_s30  ;;  %p1692_p2 = scmp.lt.s32.totalorder %s1686_s30, %s1686_s30 }
 0x1ab   :  { %1037 = vmatprep.mubr.bf16.mxu1 %v263_v32  ;;  %1080 = vmatprep.mubr.bf16.mxu0 %v263_v32  ;;  %p1693_p3 = por %p1692_p2, %p1691_p1 }
 0x1ac   :  { %1038 = vmatmul.mubr.bf16.vlgmr.msra.gmra.mrb[0].mxu1 %v2056_v16  ;;  %1081 = vmatmul.mubr.bf16.vlgmr.msra.gmra.mrb[4].mxu0 %v2056_v16 }
 0x1ad   :  { %1092 = vmatpush1.bf16.msra.mxu1 %v1590_v15  ;;  %1445 = vmatpush3.bf16.msra.mxu0 %v1594_v33  ;;  %p1694_p4 = pnand %p1693_p3, %p1687_p0 }
 0x1ae   :  { %1123 = vmatprep.mubr.bf16.mxu1 %v263_v32  ;;  %1166 = vmatprep.mubr.bf16.mxu0 %v263_v32 }
 0x1af   :  { %1093 = vmatprep.subr.bf16.mxu1 %v1597_v34  ;;  %1446 = vmatprep.subr.bf16.mxu0 %v1598_v35 }
 0x1b1   :  { %1094 = vmatpush1.bf16.msra.mxu1 %v1595_v36  ;;  %1447 = vmatpush3.bf16.msra.mxu0 %v1599_v37 }
 0x1b2   :  { %1095 = vmatprep.subr.bf16.mxu1 %v1602_v38  ;;  %1448 = vmatprep.subr.bf16.mxu0 %v1603_v39 }
 0x1b5   :  { %1096 = vmatpush1.bf16.msra.mxu1 %v1600_v40  ;;  %1449 = vmatpush3.bf16.msra.mxu0 %v1604_v41 }
 0x1b6   :  { %1097 = vmatprep.subr.bf16.mxu1 %v1607_v42  ;;  %1450 = vmatprep.subr.bf16.mxu0 %v1608_v43 }
 0x1b9   :  { %1098 = vmatpush1.bf16.msra.mxu1 %v1605_v44  ;;  %1451 = vmatpush3.bf16.msra.mxu0 %v1609_v45 }
 0x1ba   :  { %1099 = vmatprep.subr.bf16.mxu1 %v1612_v46  ;;  %1452 = vmatprep.subr.bf16.mxu0 %v1613_v47 }
 0x1bd   :  { %1100 = vmatpush1.bf16.msra.mxu1 %v1610_v48  ;;  %1453 = vmatpush3.bf16.msra.mxu0 %v1614_v49 }
 0x1be   :  { %1101 = vmatprep.subr.bf16.mxu1 %v1617_v50  ;;  %1454 = vmatprep.subr.bf16.mxu0 %v1618_v51 }
 0x1c1   :  { %1102 = vmatpush1.bf16.msra.mxu1 %v1615_v52  ;;  %1455 = vmatpush3.bf16.msra.mxu0 %v1619_v53 }
 0x1c2   :  { %1103 = vmatprep.subr.bf16.mxu1 %v1622_v54  ;;  %1456 = vmatprep.subr.bf16.mxu0 %v1623_v55 }
 0x1c5   :  { %1104 = vmatpush1.bf16.msra.mxu1 %v1620_v58  ;;  %1457 = vmatpush3.bf16.msra.mxu0 %v1624_v60 }
 0x1c6   :  { %1105 = vmatprep.subr.bf16.mxu1 %v1627_v61  ;;  %1458 = vmatprep.subr.bf16.mxu0 %v1628_v62 }
 0x1c9   :  { %1106 = vmatpush1.bf16.msra.mxu1 %v1625_v63  ;;  %1459 = vmatpush3.bf16.msra.mxu0 %v1629_v0 }
 0x1ca   :  { %1107 = vmatprep.subr.bf16.mxu1 %v1632_v1 }
 0x1cc   :  { %1167 = vmatmul.mubr.bf16.vlgmr.msra.gmra.mrb[8].mxu0 %v2056_v16 }
 0x1cd   :  { %1108 = vmatpush1.bf16.msra.mxu1 %v1630_v2 }
 0x1ce   :  { %1109 = vmatprep.subr.bf16.mxu1 %v1635_v3 }
 0x1d1   :  { %1110 = vmatpush1.bf16.msra.mxu1 %v1633_v4 }
 0x1d2   :  { %1111 = vmatprep.subr.bf16.mxu1 %v1638_v5 }
 0x1d5   :  { %1112 = vmatpush1.bf16.msra.mxu1 %v1636_v6 }
 0x1d6   :  { %1113 = vmatprep.subr.bf16.mxu1 %v1641_v7 }
 0x1d9   :  { %1114 = vmatpush1.bf16.msra.mxu1 %v1639_v8 }
 0x1da   :  { %1115 = vmatprep.subr.bf16.mxu1 %v1644_v10 }
 0x1dd   :  { %1116 = vmatpush1.bf16.msra.mxu1 %v1642_v12 }
 0x1de   :  { %1117 = vmatprep.subr.bf16.mxu1 %v1647_v13 }
 0x1e1   :  { %1118 = vmatpush1.bf16.msra.mxu1 %v1645_v14 }
 0x1e2   :  { %1119 = vmatprep.subr.bf16.mxu1 %v1650_v17  ;;  %v420_v17 = vsub.s32 6, %v1913_v56 }
 0x1e5   :  { %1120 = vmatpush1.bf16.msra.mxu1 %v1648_v18 }
 0x1e6   :  { %1121 = vmatprep.subr.bf16.mxu1 %v1653_v19  ;;  %v421_v19 = vrot.slane %v2201_v22, %v420_v17 }
 0x1e9   :  { %1122 = vmatpush1.bf16.msra.mxu1 %v1651_v20 }
 0x1ec   :  { %1124 = vmatmul.mubr.bf16.vlgmr.msra.gmra.mrb[4].mxu1 %v2056_v16 }
 0x27f   :  { %v1039_v26 = vpop.f32.mrb[0].mxu1  ;;  %v1082_v27 = vpop.f32.mrb[4].mxu0 }
 0x280   :  { %v1040_v28 = vadd.f32 %v1039_v26, %v397_v11  ;;  %v1083_v29 = vadd.f32 %v1082_v27, %v405_v23  ;;  %v1041_v30 = vpop.f32.mrb[1].mxu1  ;;  %v1084_v31 = vpop.f32.mrb[5].mxu0 }
 0x281   :  { %v1042_v32 = vadd.f32 %v1041_v30, %v401_v24  ;;  %v1085_v15 = vadd.f32 %v1084_v31, %v409_v25  ;;  %v1043_v16 = vpop.f32.mrb[2].mxu1  ;;  %v1086_v33 = vpop.f32.mrb[6].mxu0 }
 0x282   :  { %v1175_v34 = vmul.f32 0.5, %v1040_v28  ;;  %v1177_v35 = vmul.f32 0.5, %v1083_v29  ;;  %v1044_v57 = vadd.f32 %v1043_v16, %v397_v11  ;;  %v1087_v36 = vadd.f32 %v1086_v33, %v405_v23  ;;  %v1045_v37 = vpop.f32.mrb[3].mxu1  ;;  %v1088_v38 = vpop.f32.mrb[7].mxu0 }
 0x283   :  { %v1176_v39 = vmul.f32 0.5, %v1042_v32  ;;  %v1178_v59 = vmul.f32 0.5, %v1085_v15  ;;  %v1046_v40 = vadd.f32 %v1045_v37, %v401_v24  ;;  %v1089_v41 = vadd.f32 %v1088_v38, %v409_v25 }
 0x284   :  { %1658 = vtanh.f32 %v1175_v34  ;;  %v1182_v42 = vmul.f32 0.5, %v1044_v57  ;;  %v1184_v43 = vmul.f32 0.5, %v1087_v36  ;;  %v412_v34 = vsub.s32 4, %v1913_v56 }
 0x285   :  { %1660 = vtanh.f32 %v1177_v35  ;;  %v1183_v44 = vmul.f32 0.5, %v1046_v40  ;;  %v1185_v45 = vmul.f32 0.5, %v1089_v41  ;;  %v416_v35 = vsub.s32 5, %v1913_v56 }
 0x286   :  { %1662 = vtanh.f32 %v1176_v39  ;;  %v413_v57 = vrot.slane %v2201_v22, %v412_v34 }
 0x287   :  { %1664 = vtanh.f32 %v1178_v59  ;;  %v417_v36 = vrot.slane %v2201_v22, %v416_v35 }
 0x288   :  { %1666 = vtanh.f32 %v1182_v42 }
 0x289   :  { %1668 = vtanh.f32 %v1184_v43 }
 0x28a   :  { %1670 = vtanh.f32 %v1183_v44 }
 0x28b   :  { %1672 = vtanh.f32 %v1185_v45 }
 0x28e   :  { %v1659_v46 = vpop.eup %1658 }
 0x28f   :  { %v1661_v47 = vpop.eup %1660  ;;  %v1203_v48 = vadd.f32 1.0, %v1659_v46 }
 0x290   :  { %v1663_v49 = vpop.eup %1662  ;;  %v1205_v50 = vadd.f32 1.0, %v1661_v47 }
 0x291   :  { %v1665_v51 = vpop.eup %1664  ;;  %v1217_v52 = vmul.f32 0.5, %v1203_v48  ;;  %v1204_v53 = vadd.f32 1.0, %v1663_v49 }
 0x292   :  { %v1667_v54 = vpop.eup %1666  ;;  %v1219_v55 = vmul.f32 0.5, %v1205_v50  ;;  %v1206_v58 = vadd.f32 1.0, %v1665_v51 }
 0x293   :  { %v1669_v60 = vpop.eup %1668  ;;  %v1218_v61 = vmul.f32 0.5, %v1204_v53  ;;  %v1210_v62 = vadd.f32 1.0, %v1667_v54 }
 0x294   :  { %v1671_v63 = vpop.eup %1670  ;;  %v1220_v0 = vmul.f32 0.5, %v1206_v58  ;;  %v1212_v1 = vadd.f32 1.0, %v1669_v60 }
 0x295   :  { %v1673_v2 = vpop.eup %1672  ;;  %v1436_v3 = vpack.c.bf16 %v1218_v61, %v1217_v52  ;;  %v1224_v4 = vmul.f32 0.5, %v1210_v62  ;;  %v1211_v5 = vadd.f32 1.0, %v1671_v63 }
 0x296   :  { %v1437_v6 = vpack.c.bf16 %v1220_v0, %v1219_v55  ;;  %v1226_v7 = vmul.f32 0.5, %v1212_v1  ;;  %v1213_v8 = vadd.f32 1.0, %v1673_v2 }
 0x297   :  { %1275 = vst [vmem:[#allocation2] sm:$0xff] %v1436_v3  ;;  %v1225_v10 = vmul.f32 0.5, %v1211_v5 }
 0x298   :  { %1276 = vst [vmem:[#allocation2 + $0x8] sm:$0xff] %v1437_v6  ;;  %v1227_v12 = vmul.f32 0.5, %v1213_v8 }
 0x299   :  { %v1440_v13 = vpack.c.bf16 %v1225_v10, %v1224_v4 }
 0x29a   :  { %v1441_v14 = vpack.c.bf16 %v1227_v12, %v1226_v7 }
 0x29b   :  { %1280 = vst [vmem:[#allocation2 + $0x1c] sm:$0xff] %v1440_v13 }
 0x29c   :  { %1281 = vst [vmem:[#allocation2 + $0x24] sm:$0xff] %v1441_v14 }
 0x29f   :  { %v1460_v18 = vpop.f32.mrb[8].mxu0 }
 0x2a0   :  { %v1461_v20 = vpop.f32.mrb[9].mxu0 }
 0x2a1   :  { %v1462_v21 = vadd.f32 %v1461_v20, %v1460_v18  ;;  %v1463_v9 = vpop.f32.mrb[10].mxu0 }
 0x2a2   :  { %v1464_v11 = vpop.f32.mrb[11].mxu0 }
 0x2a3   :  { %v1169_v23 = vadd.f32 %v1462_v21, %v421_v19  ;;  %v1465_v24 = vadd.f32 %v1464_v11, %v1463_v9 }
 0x2a5   :  { %v1181_v25 = vmul.f32 0.5, %v1169_v23  ;;  %v1172_v26 = vadd.f32 %v1465_v24, %v421_v19 }
 0x2a7   :  { %1674 = vtanh.f32 %v1181_v25  ;;  %v1188_v27 = vmul.f32 0.5, %v1172_v26 }
 0x2a9   :  { %1676 = vtanh.f32 %v1188_v27 }
 0x2b1   :  { %v1675_v28 = vpop.eup %1674 }
 0x2b2   :  { %v1209_v29 = vadd.f32 1.0, %v1675_v28 }
 0x2b3   :  { %v1677_v30 = vpop.eup %1676 }
 0x2b4   :  { %v1223_v31 = vmul.f32 0.5, %v1209_v29  ;;  %v1216_v32 = vadd.f32 1.0, %v1677_v30 }
 0x2b6   :  { %v1439_v15 = vpack.c.bf16 %v1223_v31, %v1223_v31  ;;  %v1230_v16 = vmul.f32 0.5, %v1216_v32 }
 0x2b8   :  { %1279 = vst.msk [vmem:[#allocation2 + $0x18] sm:$0xf] %vm1278_vm4, %v1439_v15  ;;  %v1443_v33 = vpack.c.bf16 %v1230_v16, %v1230_v16 }
 0x2ba   :  { %1283 = vst.msk [vmem:[#allocation2 + $0x34] sm:$0xf] %vm1278_vm4, %v1443_v33 }
 0x2bf   :  { %v1125_v37 = vpop.f32.mrb[4].mxu1 }
 0x2c0   :  { %v1126_v38 = vadd.f32 %v1125_v37, %v413_v57  ;;  %v1127_v39 = vpop.f32.mrb[5].mxu1 }
 0x2c1   :  { %v1128_v59 = vadd.f32 %v1127_v39, %v417_v36  ;;  %v1129_v40 = vpop.f32.mrb[6].mxu1 }
 0x2c2   :  { %v1179_v41 = vmul.f32 0.5, %v1126_v38  ;;  %v1130_v42 = vadd.f32 %v1129_v40, %v413_v57  ;;  %v1131_v43 = vpop.f32.mrb[7].mxu1 }
 0x2c3   :  { %v1180_v44 = vmul.f32 0.5, %v1128_v59  ;;  %v1132_v45 = vadd.f32 %v1131_v43, %v417_v36 }
 0x2c4   :  { %1678 = vtanh.f32 %v1179_v41  ;;  %v1186_v46 = vmul.f32 0.5, %v1130_v42 }
 0x2c5   :  { %1680 = vtanh.f32 %v1180_v44  ;;  %v1187_v47 = vmul.f32 0.5, %v1132_v45 }
 0x2c6   :  { %1682 = vtanh.f32 %v1186_v46 }
 0x2c7   :  { %1684 = vtanh.f32 %v1187_v47 }
 0x2ce   :  { %v1679_v56 = vpop.eup %1678 }
 0x2cf   :  { %v1681_v48 = vpop.eup %1680  ;;  %v1207_v49 = vadd.f32 1.0, %v1679_v56 }
 0x2d0   :  { %v1683_v22 = vpop.eup %1682  ;;  %v1208_v50 = vadd.f32 1.0, %v1681_v48 }
 0x2d1   :  { %v1685_v51 = vpop.eup %1684  ;;  %v1221_v52 = vmul.f32 0.5, %v1207_v49  ;;  %v1214_v53 = vadd.f32 1.0, %v1683_v22 }
 0x2d2   :  { %v1222_v54 = vmul.f32 0.5, %v1208_v50  ;;  %v1215_v55 = vadd.f32 1.0, %v1685_v51 }
 0x2d3   :  { %v1228_v58 = vmul.f32 0.5, %v1214_v53 }
 0x2d4   :  { %v1438_v60 = vpack.c.bf16 %v1222_v54, %v1221_v52  ;;  %v1229_v61 = vmul.f32 0.5, %v1215_v55 }
 0x2d6   :  { %1277 = vst [vmem:[#allocation2 + $0x10] sm:$0xff] %v1438_v60  ;;  %v1442_v62 = vpack.c.bf16 %v1229_v61, %v1228_v58 }
 0x2d8   :  { %1282 = vst [vmem:[#allocation2 + $0x2c] sm:$0xff] %v1442_v62 }
 0x2d9   :  { %1697 = shalt.err (!%p1694_p4)
}
 0x2da   :  { %s1698_s10 = scalar_lea.hbm %s2235_s7, 896 }
 0x2db   :  { %p1699_p5 = scmp.ne.s32.totalorder %s2235_s7, %s1698_s10  ;;  %p1702_p6 = scmp.lt.u32.totalorder %s1698_s10, %s2235_s7 }
 0x2dd   :  { %p1704_p7 = pnand %p1702_p6, %p1699_p5 }
 0x2df   :  { %1707 = shalt.err (!%p1704_p7)
}
 0x2e0   :  { %s1712_s14 = smov 448   ;;  %s1713_s15 = smov 28  }
 0x2e1   :  { %1295 = dma.vmem_to_hbm [thread:$0]  %s1290_s6, 896, %s2235_s7, [#allocation3], %s1712_s14, %s1712_s14, %s1713_s15  }
 0x2e2   :  { %1708 = dma.done.wait [#allocation3], 896  }
 0x2e3   :  { %1709 = vsyncadd [#allocation3], 4294966400 }
 0x2e4   :  { %1299 = vsyncpa [#allocation3], 1 }

</bundles_post_ra>
